<compile_context>
chip_gen: v5e
topology: v5e:2x2
jax: 0.10.0
libtpu: 0.0.40
codegen_flags: <defaults>
</compile_context>

<pallas_src>
import functools

import jax
import jax.numpy as jnp
from jax.experimental import pallas as pl
from jax.experimental.pallas import tpu as pltpu


def _round_up(v, m):
    return ((v + m - 1) // m) * m


def _fused_mlp_kernel(*refs, n_layers, activation, negative_slope):
    """Fused MLP: all layers computed per M-tile, intermediates stay on-chip.

    refs = (x_ref, w_0, b_0, ..., w_{L-1}, b_{L-1}, o_ref).
    Weights / biases are zero-padded to 128-lane multiples; padded columns stay
    exactly zero through every layer (bias pad = 0, LeakyReLU(0) = 0), so only
    the wrapper-side slice is needed to recover the true output.
    """
    x_ref = refs[0]
    o_ref = refs[-1]
    h = x_ref[...]
    for l in range(n_layers):
        w = refs[1 + 2 * l][...]
        b = refs[2 + 2 * l][...]
        y = jnp.dot(h, w, preferred_element_type=jnp.float32) + b
        if activation:
            y = jnp.where(y >= 0, y, negative_slope * y)
        h = y
    o_ref[...] = h.astype(o_ref.dtype)


def mlp_forward(x, params, *, dropout=None, activation=True, negative_slope=0.2):
    """Forward pass of MLP.layer_seq as one fused pallas_call.

    x: (M, K0) f32; params: list of (W_l, b_l) with W_l stored as (in, out)
    so that x @ W_l == F.linear(x, W_torch_l) for W_torch_l of shape (out, in).
    """
    # TODO(synk): nn.Dropout training-mode random masking not implemented;
    # inference semantics (identity) are used, consistent with dropout=(0.0, 0.0).
    M, K0 = x.shape
    n_layers = len(params)
    assert n_layers >= 1

    # ---- pad to lane-dense / sublane-aligned shapes ------------------------
    tm = 512 if M > 512 else _round_up(M, 8)       # M tile (multiple of 8)
    M_pad = _round_up(M, tm)
    K_pad = _round_up(K0, 128)

    x_pad = jnp.zeros((M_pad, K_pad), x.dtype).at[:M, :K0].set(x)

    padded_args = []
    layer_dims = []                                 # original (K_l, N_l)
    k_prev = K_pad
    for (w, b) in params:
        k_l, n_l = w.shape                          # (in, out)
        n_pad = _round_up(n_l, 128)
        w_pad = jnp.zeros((k_prev, n_pad), w.dtype).at[:k_l, :n_l].set(w)
        b_pad = jnp.zeros((1, n_pad), b.dtype).at[0, :n_l].set(b)
        padded_args += [w_pad, b_pad]
        layer_dims.append((k_l, n_l))
        k_prev = n_pad
    N_out = params[-1][0].shape[1]
    N_out_pad = k_prev

    # ---- BlockSpecs: x/out tiled over M; weights+biases fully resident ------
    # All weights together are tiny (a few KiB padded), so they fit VMEM on
    # every TPU generation and the hidden activations never round-trip HBM.
    in_specs = [pl.BlockSpec((tm, K_pad), lambda i: (i, 0))]
    for w_pad, b_pad in zip(padded_args[0::2], padded_args[1::2]):
        kp, np_ = w_pad.shape
        in_specs.append(pl.BlockSpec((kp, np_), lambda i: (0, 0)))
        in_specs.append(pl.BlockSpec((1, np_), lambda i: (0, 0)))
    out_spec = pl.BlockSpec((tm, N_out_pad), lambda i: (i, 0))

    flops = sum(2 * M * k_l * n_l for (k_l, n_l) in layer_dims)
    bytes_accessed = (x.size + sum(w.size + b.size for w, b in params)
                      + M * N_out) * jnp.dtype(x.dtype).itemsize

    kernel = functools.partial(_fused_mlp_kernel, n_layers=n_layers,
                               activation=activation,
                               negative_slope=negative_slope)

    out_pad = pl.pallas_call(
        kernel,
        out_shape=jax.ShapeDtypeStruct((M_pad, N_out_pad), x.dtype),
        grid_spec=pltpu.PrefetchScalarGridSpec(
            num_scalar_prefetch=0,
            grid=(M_pad // tm,),
            in_specs=in_specs,
            out_specs=out_spec,
        ),
        compiler_params=pltpu.CompilerParams(
            dimension_semantics=("parallel",)),
        cost_estimate=pl.CostEstimate(flops=flops, transcendentals=0,
                                      bytes_accessed=bytes_accessed),
    )(x_pad, *padded_args)

    return out_pad[:M, :N_out]


def init_mlp_params(key, i_dim, o_dim, init_std=0.01):
    """Deterministic param init matching Linear.reset_parameters():
       trunc_normal(std=init_std, a=-2*std, b=2*std) weights, zero bias."""
    params = []
    for _i, _o in zip(i_dim, o_dim):
        key, wk = jax.random.split(key)
        w_torch = init_std * jax.random.truncated_normal(
            wk, -2.0, 2.0, (_o, _i), dtype=jnp.float32)  # PyTorch layout (out, in)
        w = w_torch.T                                     # store as (in, out)
        b = jnp.zeros((_o,), dtype=jnp.float32)
        params.append((w, b))
    return params


if __name__ == "__main__":
    # MLP(i_dim=(32, 64), o_dim=(64, 16), dropout=(0.0, 0.0),
    #     bias=True, batch_normalization=False, activation=True)
    i_dim = (32, 64)
    o_dim = (64, 16)
    dropout = (0.0, 0.0)
    batch = 8

    key = jax.random.PRNGKey(0)
    key, xk = jax.random.split(key)
    x = jax.random.normal(xk, (batch, i_dim[0]), dtype=jnp.float32)

    params = init_mlp_params(key, i_dim, o_dim, init_std=0.01)

    out = mlp_forward(x, params, dropout=dropout, activation=True)
    out = jax.block_until_ready(out)

    # Reference check in plain JAX (same math, no Pallas).
    ref = x
    for w, b in params:
        ref = ref @ w + b
        ref = jnp.where(ref >= 0, ref, 0.2 * ref)
    assert out.shape == (batch, o_dim[-1])
    assert jnp.allclose(out, ref, atol=1e-5, rtol=1e-5)

    print("KERNEL_OK")
</pallas_src>

<mosaic_0001>
module attributes {stable_mosaic.version = 11 : i64} {
  func.func @_fused_mlp_kernel(%arg0: i32, %arg1: memref<8x128xf32, #tpu.memory_space<vmem>>, %arg2: memref<128x128xf32, #tpu.memory_space<vmem>>, %arg3: memref<1x128xf32, #tpu.memory_space<vmem>>, %arg4: memref<128x128xf32, #tpu.memory_space<vmem>>, %arg5: memref<1x128xf32, #tpu.memory_space<vmem>>, %arg6: memref<8x128xf32, #tpu.memory_space<vmem>>) attributes {dimension_semantics = [#tpu.dimension_semantics<parallel>], iteration_bounds = array<i64: 1>, scalar_prefetch = 0 : i64, scratch_operands = 0 : i64, tpu.core_type = #tpu.core_type<tc>, window_params = [{transform_indices = @transform_0, window_bounds = array<i64: 8, 128>}, {pipeline_mode = #tpu.pipeline_mode<synchronous>, transform_indices = @transform_1, window_bounds = array<i64: 128, 128>}, {pipeline_mode = #tpu.pipeline_mode<synchronous>, transform_indices = @transform_2, window_bounds = array<i64: 1, 128>}, {pipeline_mode = #tpu.pipeline_mode<synchronous>, transform_indices = @transform_3, window_bounds = array<i64: 128, 128>}, {pipeline_mode = #tpu.pipeline_mode<synchronous>, transform_indices = @transform_4, window_bounds = array<i64: 1, 128>}, {transform_indices = @transform_5, window_bounds = array<i64: 8, 128>}]} {
    %c0 = arith.constant 0 : index
    %c0_0 = arith.constant 0 : index
    %0 = vector.load %arg1[%c0, %c0_0] : memref<8x128xf32, #tpu.memory_space<vmem>>, vector<8x128xf32>
    %c0_1 = arith.constant 0 : index
    %c0_2 = arith.constant 0 : index
    %1 = vector.load %arg2[%c0_1, %c0_2] : memref<128x128xf32, #tpu.memory_space<vmem>>, vector<128x128xf32>
    %c0_3 = arith.constant 0 : index
    %c0_4 = arith.constant 0 : index
    %2 = vector.load %arg3[%c0_3, %c0_4] : memref<1x128xf32, #tpu.memory_space<vmem>>, vector<1x128xf32>
    %cst = arith.constant dense<0.000000e+00> : vector<8x128xf32>
    %3 = tpu.matmul %0, %1, %cst {dimension_numbers = #tpu.dot_dimension_numbers<[1], [0], [0], [1], [0, 0, 1, 1], [], []>} : vector<8x128xf32>, vector<128x128xf32>, vector<8x128xf32> -> vector<8x128xf32>
    %4 = vector.broadcast %2 : vector<1x128xf32> to vector<8x128xf32>
    %5 = arith.addf %3, %4 : vector<8x128xf32>
    %cst_5 = arith.constant 0.000000e+00 : f32
    %6 = vector.broadcast %cst_5 : f32 to vector<8x128xf32>
    %7 = arith.cmpf oge, %5, %6 : vector<8x128xf32>
    %cst_6 = arith.constant 2.000000e-01 : f32
    %8 = vector.broadcast %cst_6 : f32 to vector<8x128xf32>
    %9 = arith.mulf %8, %5 : vector<8x128xf32>
    %10 = arith.select %7, %5, %9 : vector<8x128xi1>, vector<8x128xf32>
    %c0_7 = arith.constant 0 : index
    %c0_8 = arith.constant 0 : index
    %11 = vector.load %arg4[%c0_7, %c0_8] : memref<128x128xf32, #tpu.memory_space<vmem>>, vector<128x128xf32>
    %c0_9 = arith.constant 0 : index
    %c0_10 = arith.constant 0 : index
    %12 = vector.load %arg5[%c0_9, %c0_10] : memref<1x128xf32, #tpu.memory_space<vmem>>, vector<1x128xf32>
    %cst_11 = arith.constant dense<0.000000e+00> : vector<8x128xf32>
    %13 = tpu.matmul %10, %11, %cst_11 {dimension_numbers = #tpu.dot_dimension_numbers<[1], [0], [0], [1], [0, 0, 1, 1], [], []>} : vector<8x128xf32>, vector<128x128xf32>, vector<8x128xf32> -> vector<8x128xf32>
    %14 = vector.broadcast %12 : vector<1x128xf32> to vector<8x128xf32>
    %15 = arith.addf %13, %14 : vector<8x128xf32>
    %cst_12 = arith.constant 0.000000e+00 : f32
    %16 = vector.broadcast %cst_12 : f32 to vector<8x128xf32>
    %17 = arith.cmpf oge, %15, %16 : vector<8x128xf32>
    %cst_13 = arith.constant 2.000000e-01 : f32
    %18 = vector.broadcast %cst_13 : f32 to vector<8x128xf32>
    %19 = arith.mulf %18, %15 : vector<8x128xf32>
    %20 = arith.select %17, %15, %19 : vector<8x128xi1>, vector<8x128xf32>
    %c0_14 = arith.constant 0 : index
    %c0_15 = arith.constant 0 : index
    %21 = vector.load %arg6[%c0_14, %c0_15] : memref<8x128xf32, #tpu.memory_space<vmem>>, vector<8x128xf32>
    tpu.vector_store %arg6[%c0_14, %c0_15], %20 {strides = array<i32>} : memref<8x128xf32, #tpu.memory_space<vmem>>, vector<8x128xf32>,
    return
  }
  func.func @transform_0(%arg0: i32) -> (i32, i32) {
    %c0_i32 = arith.constant 0 : i32
    %c0_i32_0 = arith.constant 0 : i32
    return %arg0, %c0_i32 : i32, i32
  }
  func.func @transform_1(%arg0: i32) -> (i32, i32) {
    %c0_i32 = arith.constant 0 : i32
    %c0_i32_0 = arith.constant 0 : i32
    %c0_i32_1 = arith.constant 0 : i32
    return %c0_i32, %c0_i32_0 : i32, i32
  }
  func.func @transform_2(%arg0: i32) -> (i32, i32) {
    %c0_i32 = arith.constant 0 : i32
    %c0_i32_0 = arith.constant 0 : i32
    %c0_i32_1 = arith.constant 0 : i32
    return %c0_i32, %c0_i32_0 : i32, i32
  }
  func.func @transform_3(%arg0: i32) -> (i32, i32) {
    %c0_i32 = arith.constant 0 : i32
    %c0_i32_0 = arith.constant 0 : i32
    %c0_i32_1 = arith.constant 0 : i32
    return %c0_i32, %c0_i32_0 : i32, i32
  }
  func.func @transform_4(%arg0: i32) -> (i32, i32) {
    %c0_i32 = arith.constant 0 : i32
    %c0_i32_0 = arith.constant 0 : i32
    %c0_i32_1 = arith.constant 0 : i32
    return %c0_i32, %c0_i32_0 : i32, i32
  }
  func.func @transform_5(%arg0: i32) -> (i32, i32) {
    %c0_i32 = arith.constant 0 : i32
    %c0_i32_0 = arith.constant 0 : i32
    return %arg0, %c0_i32 : i32, i32
  }
}

</mosaic_0001>

<bundles_post_ra>
// kernel: tpu_custom_call.1
= control target key start
LH: loop header
LB: loop body
LE: loop exit
PB: predicated region body
PF: predicated region fallthrough
CT: control target
= control target key end

     0   :  { %10 = vsyncpa [#allocation3], 0  ;;  %s336_s0 = inlined_call_operand.hbm [shape: f32[8,128], index: 0, kind: input, shape index: {}]   ;;  %s337_s1 = inlined_call_operand.hbm [shape: f32[128,128], index: 1, kind: input, shape index: {}]   ;;  %s338_s2 = inlined_call_operand.vmem [shape: f32[1,128], index: 2, kind: input, shape index: {}]   ;;  %s339_s3 = inlined_call_operand.hbm [shape: f32[128,128], index: 3, kind: input, shape index: {}]   ;;  %s340_s4 = inlined_call_operand.vmem [shape: f32[1,128], index: 4, kind: input, shape index: {}]   ;;  %s341_s5 = inlined_call_operand.hbm [shape: f32[8,128], index: 5, kind: output, shape index: {}]  }
   0x1   :  { %11 = vsyncpa [#allocation6], 0  ;;  %s28_s20 = sshll.u32 %s337_s1, 4  ;;  %s29_s20 = int_to_ptr.hbm [resolvable:$true] %s28_s20 }
   0x2   :  { %12 = vsyncpa [#allocation4], 0  ;;  %s282_s21 = smov [#allocation5]   ;;  %s18_s25 = sshll.u32 %s336_s0, 4  ;;  %s19_s25 = int_to_ptr.hbm [resolvable:$true] %s18_s25 }
   0x3   :  { %s30_s22 = sshll.u32 %s282_s21, 4  ;;  %s283_s26 = smov 128   ;;  %s31_s22 = int_to_ptr.vmem [resolvable:$true] %s30_s22 }
   0x4   :  { %s284_s27 = smov 8   ;;  %s285_s28 = smov [#allocation2]  }
   0x5   :  { %36 = dma.hbm_to_vmem [thread:$0]  %s29_s20, 2048, %s31_s22, [#allocation6], %s283_s26, %s283_s26, %s284_s27  }
   0x6   :  { %s20_s29 = sshll.u32 %s285_s28, 4  ;;  %s43_s7 = sshll.u32 %s339_s3, 4  ;;  %s21_s29 = int_to_ptr.vmem [resolvable:$true] %s20_s29  ;;  %s44_s7 = int_to_ptr.hbm [resolvable:$true] %s43_s7 }
   0x7   :  { %23 = dma.hbm_to_vmem [thread:$0]  %s19_s25, 128, %s21_s29, [#allocation3]  }
   0x8   :  { %s286_s1 = smov [#allocation7]  }
   0x9   :  { %s45_s8 = sshll.u32 %s286_s1, 4  ;;  %s46_s8 = int_to_ptr.vmem [resolvable:$true] %s45_s8 }
   0xa   :  { %51 = dma.hbm_to_vmem [thread:$0]  %s44_s7, 2048, %s46_s8, [#allocation6], %s283_s26, %s283_s26, %s284_s27  }
   0xb   :  { %276 = dma.done.wait [#allocation3], 128  }
   0xc   :  { %277 = vsyncadd [#allocation3], 4294967168 }
   0xd   :  { %278 = dma.done.wait [#allocation6], 4096  }
   0xe   :  { %279 = vsyncadd [#allocation6], 4294963200  ;;  %v82_v0 = vld [vmem:[#allocation5 + $0x78] sm:$0xff]  ;;  %v81_v1 = vld [vmem:[#allocation5 + $0x70] sm:$0xff]  ;;  %s287_s11 = smov [#allocation8]   ;;  %s161_s15 = sshll.u32 %s341_s5, 4  ;;  %s162_s15 = int_to_ptr.hbm [resolvable:$true] %s161_s15 }
   0xf   :  { %87 = vmatpush.msra.mxu0 %v82_v0  ;;  %v80_v2 = vld [vmem:[#allocation5 + $0x68] sm:$0xff]  ;;  %v79_v3 = vld [vmem:[#allocation5 + $0x60] sm:$0xff]  ;;  %v125_v4 = vld [vmem:[#allocation7 + $0x78] sm:$0xff]  ;;  %s159_s12 = sshll.u32 %s287_s11, 4  ;;  %s160_s12 = int_to_ptr.vmem [resolvable:$true] %s159_s12 }
  0x10   :  { %v78_v5 = vld [vmem:[#allocation5 + $0x58] sm:$0xff]  ;;  %130 = vmatpush.msra.mxu1 %v125_v4  ;;  %v124_v6 = vld [vmem:[#allocation7 + $0x70] sm:$0xff]  ;;  %v123_v7 = vld [vmem:[#allocation7 + $0x68] sm:$0xff] }
  0x11   :  { %88 = vmatpush.msra.mxu0 %v81_v1  ;;  %v77_v8 = vld [vmem:[#allocation5 + $0x50] sm:$0xff]  ;;  %v122_v9 = vld [vmem:[#allocation7 + $0x60] sm:$0xff]  ;;  %v76_v10 = vld [vmem:[#allocation5 + $0x48] sm:$0xff] }
  0x12   :  { %131 = vmatpush.msra.mxu1 %v124_v6  ;;  %v121_v11 = vld [vmem:[#allocation7 + $0x58] sm:$0xff]  ;;  %v75_v12 = vld [vmem:[#allocation5 + $0x40] sm:$0xff]  ;;  %v120_v13 = vld [vmem:[#allocation7 + $0x50] sm:$0xff] }
  0x13   :  { %89 = vmatpush.msra.mxu0 %v80_v2  ;;  %v74_v14 = vld [vmem:[#allocation5 + $0x38] sm:$0xff]  ;;  %v119_v15 = vld [vmem:[#allocation7 + $0x48] sm:$0xff]  ;;  %v73_v16 = vld [vmem:[#allocation5 + $0x30] sm:$0xff] }
  0x14   :  { %132 = vmatpush.msra.mxu1 %v123_v7  ;;  %v118_v17 = vld [vmem:[#allocation7 + $0x40] sm:$0xff]  ;;  %v72_v18 = vld [vmem:[#allocation5 + $0x28] sm:$0xff]  ;;  %v117_v19 = vld [vmem:[#allocation7 + $0x38] sm:$0xff] }
  0x15   :  { %90 = vmatpush.msra.mxu0 %v79_v3  ;;  %v71_v20 = vld [vmem:[#allocation5 + $0x20] sm:$0xff]  ;;  %v116_v21 = vld [vmem:[#allocation7 + $0x30] sm:$0xff]  ;;  %v70_v22 = vld [vmem:[#allocation5 + $0x18] sm:$0xff] }
  0x16   :  { %133 = vmatpush.msra.mxu1 %v122_v9  ;;  %v115_v23 = vld [vmem:[#allocation7 + $0x28] sm:$0xff]  ;;  %v69_v24 = vld [vmem:[#allocation5 + $0x10] sm:$0xff]  ;;  %v114_v25 = vld [vmem:[#allocation7 + $0x20] sm:$0xff] }
  0x17   :  { %91 = vmatpush.msra.mxu0 %v78_v5  ;;  %v68_v26 = vld [vmem:[#allocation5 + $0x8] sm:$0xff]  ;;  %v113_v27 = vld [vmem:[#allocation7 + $0x18] sm:$0xff]  ;;  %v67_v28 = vld [vmem:[#allocation5] sm:$0xff] }
  0x18   :  { %134 = vmatpush.msra.mxu1 %v121_v11  ;;  %v66_v29 = vld [vmem:[#allocation2] sm:$0xff]  ;;  %v112_v30 = vld [vmem:[#allocation7 + $0x10] sm:$0xff]  ;;  %v111_v31 = vld [vmem:[#allocation7 + $0x8] sm:$0xff] }
  0x19   :  { %92 = vmatpush.msra.mxu0 %v77_v8  ;;  %v110_v32 = vld [vmem:[#allocation7] sm:$0xff]  ;;  %v178_v33 = vld [vmem:[%s338_s2] ss:$0 sm:$0xff] }
  0x1a   :  { %135 = vmatpush.msra.mxu1 %v120_v13  ;;  %v179_v38 = vld [vmem:[%s340_s4] ss:$0 sm:$0xff] }
  0x1b   :  { %93 = vmatpush.msra.mxu0 %v76_v10 }
  0x1c   :  { %136 = vmatpush.msra.mxu1 %v119_v15 }
  0x1d   :  { %94 = vmatpush.msra.mxu0 %v75_v12 }
  0x1e   :  { %137 = vmatpush.msra.mxu1 %v118_v17 }
  0x1f   :  { %95 = vmatpush.msra.mxu0 %v74_v14 }
  0x20   :  { %138 = vmatpush.msra.mxu1 %v117_v19 }
  0x21   :  { %96 = vmatpush.msra.mxu0 %v73_v16 }
  0x22   :  { %139 = vmatpush.msra.mxu1 %v116_v21 }
  0x23   :  { %97 = vmatpush.msra.mxu0 %v72_v18 }
  0x24   :  { %140 = vmatpush.msra.mxu1 %v115_v23 }
  0x25   :  { %98 = vmatpush.msra.mxu0 %v71_v20 }
  0x26   :  { %141 = vmatpush.msra.mxu1 %v114_v25 }
  0x27   :  { %99 = vmatpush.msra.mxu0 %v70_v22 }
  0x28   :  { %142 = vmatpush.msra.mxu1 %v113_v27 }
  0x29   :  { %100 = vmatpush.msra.mxu0 %v69_v24 }
  0x2a   :  { %143 = vmatpush.msra.mxu1 %v112_v30 }
  0x2b   :  { %101 = vmatpush.msra.mxu0 %v68_v26 }
  0x2c   :  { %144 = vmatpush.msra.mxu1 %v111_v31 }
  0x2d   :  { %102 = vmatpush.msra.mxu0 %v67_v28 }
  0x2e   :  { %103 = vmatmul.f32.vlgmr.msra.gmra.mxu0 %v66_v29  ;;  %145 = vmatpush.msra.mxu1 %v110_v32 }
  0xab   :  { %v104_v34 = vpop.f32.mrf.mxu0 }
  0xac   :  { %v105_v35 = vadd.f32 %v178_v33, %v104_v34 }
  0xae   :  { %vm107_vm0 = vcmp.ge.f32.partialorder %v105_v35, 0.0  ;;  %v108_v36 = vmul.f32 0.2, %v105_v35 }
  0xb0   :  { %v109_v37 = vsel %vm107_vm0, %v105_v35, %v108_v36 }
  0xb1   :  { %146 = vmatmul.f32.vlgmr.msra.gmra.mxu1 %v109_v37 }
 0x12e   :  { %v147_v39 = vpop.f32.mrf.mxu1 }
 0x12f   :  { %v148_v40 = vadd.f32 %v179_v38, %v147_v39 }
 0x131   :  { %vm150_vm1 = vcmp.ge.f32.partialorder %v148_v40, 0.0  ;;  %v151_v41 = vmul.f32 0.2, %v148_v40 }
 0x133   :  { %v152_v42 = vsel %vm150_vm1, %v148_v40, %v151_v41 }
 0x134   :  { %153 = vst [vmem:[#allocation8] sm:$0xff] %v152_v42 }
 0x135   :  { %164 = dma.vmem_to_hbm [thread:$0]  %s160_s12, 128, %s162_s15, [#allocation4]  }
 0x136   :  { %280 = dma.done.wait [#allocation4], 128  }
 0x137   :  { %281 = vsyncadd [#allocation4], 4294967168 }
 0x138   :  { %169 = vsyncpa [#allocation3], 1 }
 0x139   :  { %170 = vsyncpa [#allocation6], 1 }
 0x13a   :  { %171 = vsyncpa [#allocation4], 1 }

</bundles_post_ra>
